<compile_context>
chip_gen: v5e
topology: v5e:2x2
jax: 0.10.0
libtpu: 0.0.40
codegen_flags: <defaults>
</compile_context>

<pallas_src>
import functools

import jax
import jax.numpy as jnp
from jax import lax
from jax.experimental import pallas as pl
from jax.experimental.pallas import tpu as pltpu

INPUT_SIZE = 32      # input_size
NUM_EXPERTS = 8      # num_experts
TOP_K = 2            # top_k
NOISE_EPS = 0.01     # noise_epsilon
BATCH = 8

LANE = 128           # batch sits on the 128-lane axis
TILE_B_MAX = 4096    # batch tile cap (multiple of 128, >=0.5 MB DMA per step)


def _round_up(n, m):
    return ((n + m - 1) // m) * m


# ---------------------------------------------------------------------------
# in-kernel helpers (tensors are [E or 2E, tb]: experts on sublanes,
# batch on the 128-lane axis)
# ---------------------------------------------------------------------------
def _softplus(x):
    # numerically stable softplus
    return jnp.log1p(jnp.exp(-jnp.abs(x))) + jnp.maximum(x, 0.0)


def _topk_mask(logits, k):
    """Boolean mask of the top-k experts per batch column (ties -> lowest
    expert index).  k is tiny & static -> unrolled at trace time.  At large tb
    the [E, tb] temporaries live in VMEM, not vregs; the kernel stays
    HBM-bandwidth bound so this chain is filler on the VPU/XLU slots."""
    E, B = logits.shape
    eidx = lax.broadcasted_iota(jnp.int32, (E, B), 0)
    remaining = logits
    mask = jnp.zeros((E, B), dtype=jnp.bool_)
    for _ in range(k):
        cmax = jnp.max(remaining, axis=0, keepdims=True)
        sel = jnp.min(jnp.where(remaining == cmax, eidx, E), axis=0, keepdims=True)
        onehot = eidx == sel
        mask = jnp.logical_or(mask, onehot)
        remaining = jnp.where(onehot, -jnp.inf, remaining)
    return mask


def _masked_softmax(logits, mask):
    masked = jnp.where(mask, logits, -jnp.inf)
    m = jnp.max(masked, axis=0, keepdims=True)
    p = jnp.where(mask, jnp.exp(masked - m), 0.0)
    return p / jnp.sum(p, axis=0, keepdims=True)


def _softmax(logits):
    m = jnp.max(logits, axis=0, keepdims=True)
    p = jnp.exp(logits - m)
    return p / jnp.sum(p, axis=0, keepdims=True)


# ---------------------------------------------------------------------------
# kernels
# ---------------------------------------------------------------------------
def gating_train_kernel(x_ref, w_ref, eps_ref, out_ref, *, top_k, noise_epsilon):
    # x_ref:   [tb, D]  (bf16)  batch-major, no wrapper transpose
    # w_ref:   [2E, D]  (bf16)  gate stacked on noise_gate
    # eps_ref: [E, tb]  (f32)   N(0,1) noise
    # out_ref: [2E, tb] (f32)   rows [:E] = gates, rows [E:] = load
    logits = lax.dot_general(
        w_ref[...], x_ref[...],
        dimension_numbers=(((1,), (1,)), ((), ())),
        preferred_element_type=jnp.float32)                        # [2E, tb] f32
    E = eps_ref.shape[0]
    clean = logits[:E, :]
    noise_raw = logits[E:, :]
    # spec: noise = randn * softplus(noise_logits) * noise_epsilon
    noisy = clean + eps_ref[...] * _softplus(noise_raw) * noise_epsilon
    mask = _topk_mask(noisy, top_k)
    out_ref[:E, :] = _masked_softmax(noisy, mask)   # scatter(softmax(topk))
    out_ref[E:, :] = _softmax(clean)                # load


def gating_eval_kernel(x_ref, w_ref, out_ref, *, top_k):
    # x_ref: [tb, D] (bf16)   w_ref: [E, D] (bf16)   out_ref: [2E, tb] (f32)
    clean = lax.dot_general(
        w_ref[...], x_ref[...],
        dimension_numbers=(((1,), (1,)), ((), ())),
        preferred_element_type=jnp.float32)                        # [E, tb] f32
    E = w_ref.shape[0]
    mask = _topk_mask(clean, top_k)
    out_ref[:E, :] = _masked_softmax(clean, mask)
    out_ref[E:, :] = _softmax(clean)


# ---------------------------------------------------------------------------
# wrapper
# ---------------------------------------------------------------------------
def pack_gating_weights(w_gate, w_noise, dtype=jnp.bfloat16):
    """Hoistable: fuse gate + noise_gate weights into one [2E, D] MXU operand."""
    return jnp.concatenate(
        [jnp.asarray(w_gate, dtype), jnp.asarray(w_noise, dtype)], axis=0)


def _choose_tile(batch, tile_b):
    b_aligned = _round_up(batch, LANE)
    tb = min(_round_up(tile_b, LANE), b_aligned)
    # v7x megacore: keep >=2 grid steps (when there is enough work) so the
    # "parallel" batch axis can be sharded across both TensorCores.
    if tb >= b_aligned and b_aligned >= 2 * LANE:
        tb = _round_up(pl.cdiv(b_aligned, 2), LANE)
    return tb


def noisy_topk_gating(x, w_gate, w_noise=None, *, training=False, noise_key=None,
                      w_packed=None, top_k=TOP_K, noise_epsilon=NOISE_EPS,
                      tile_b=TILE_B_MAX, matmul_dtype=jnp.bfloat16,
                      expert_major=True):
    """Returns (gates, load).  With expert_major=True (default) both are
    [num_experts, batch] (lane-dense, no output transpose); pass
    expert_major=False to get the PyTorch layout [batch, num_experts]."""
    B, D = x.shape
    E = w_gate.shape[0] if w_gate is not None else w_packed.shape[0] // 2

    tb = _choose_tile(B, tile_b)
    B_pad = _round_up(B, tb)
    grid = (B_pad // tb,)

    # x stays batch-major; only a dtype cast (fuses with the producer under jit)
    x_c = jnp.asarray(x, matmul_dtype)
    if B_pad != B:
        x_c = jnp.pad(x_c, ((0, B_pad - B), (0, 0)))

    out_shape = jax.ShapeDtypeStruct((2 * E, B_pad), jnp.float32)
    out_spec = pl.BlockSpec((2 * E, tb), lambda i: (0, i))
    cparams = pltpu.CompilerParams(dimension_semantics=("parallel",))

    if training:
        assert noise_key is not None, "training mode needs noise_key"
        if w_packed is None:
            assert w_noise is not None
            w_packed = pack_gating_weights(w_gate, w_noise, matmul_dtype)
        # TODO(synk): generate the Gaussian noise in-kernel (pltpu.prng_seed +
        # pltpu.prng_random_bits + bits->normal) to drop this HBM stream; the
        # jax.random stream is kept for portability (neither is bit-exact with
        # torch.randn_like).
        eps = jax.random.normal(noise_key, (E, B), dtype=jnp.float32)
        if B_pad != B:
            eps = jnp.pad(eps, ((0, 0), (0, B_pad - B)))

        bytes_accessed = (x_c.size * x_c.dtype.itemsize
                          + w_packed.size * w_packed.dtype.itemsize
                          + eps.size * 4 + 2 * E * B_pad * 4)
        cost = pl.CostEstimate(flops=2 * B_pad * D * 2 * E,
                               transcendentals=4 * E * B_pad,
                               bytes_accessed=bytes_accessed)
        kernel = functools.partial(gating_train_kernel, top_k=top_k,
                                   noise_epsilon=noise_epsilon)
        out = pl.pallas_call(
            kernel,
            out_shape=out_shape,
            grid=grid,
            in_specs=[
                pl.BlockSpec((tb, D), lambda i: (i, 0)),        # x tile (batch-major)
                pl.BlockSpec((2 * E, D), lambda i: (0, 0)),     # fused weights
                pl.BlockSpec((E, tb), lambda i: (0, i)),        # N(0,1) noise tile
            ],
            out_specs=out_spec,
            compiler_params=cparams,
            cost_estimate=cost,
        )(x_c, w_packed, eps)
    else:
        # eval mode: w_noise never touched -> not even passed to the kernel
        w_c = jnp.asarray(w_gate, matmul_dtype)
        bytes_accessed = (x_c.size * x_c.dtype.itemsize
                          + w_c.size * w_c.dtype.itemsize + 2 * E * B_pad * 4)
        cost = pl.CostEstimate(flops=2 * B_pad * D * E,
                               transcendentals=3 * E * B_pad,
                               bytes_accessed=bytes_accessed)
        kernel = functools.partial(gating_eval_kernel, top_k=top_k)
        out = pl.pallas_call(
            kernel,
            out_shape=out_shape,
            grid=grid,
            in_specs=[
                pl.BlockSpec((tb, D), lambda i: (i, 0)),        # x tile (batch-major)
                pl.BlockSpec((E, D), lambda i: (0, 0)),         # gate.weight
            ],
            out_specs=out_spec,
            compiler_params=cparams,
            cost_estimate=cost,
        )(x_c, w_c)

    gates = out[:E, :B]
    load = out[E:, :B]
    if expert_major:
        return gates, load               # [E, B] — no output transpose
    return gates.T, load.T               # PyTorch layout [B, E]


# ---------------------------------------------------------------------------
# demo / check
# ---------------------------------------------------------------------------
if __name__ == "__main__":
    key = jax.random.PRNGKey(0)
    kx, kg, kn, keps = jax.random.split(key, 4)

    x = jax.random.normal(kx, (BATCH, INPUT_SIZE), dtype=jnp.float32)
    # nn.init.normal_(weight, std=0.1); weight shape = [num_experts, input_size]
    w_gate = 0.1 * jax.random.normal(kg, (NUM_EXPERTS, INPUT_SIZE), dtype=jnp.float32)
    w_noise = 0.1 * jax.random.normal(kn, (NUM_EXPERTS, INPUT_SIZE), dtype=jnp.float32)

    # reference uses the same bf16-rounded operands as the kernel's MXU path
    xr = x.astype(jnp.bfloat16).astype(jnp.float32)
    wgr = w_gate.astype(jnp.bfloat16).astype(jnp.float32)
    wnr = w_noise.astype(jnp.bfloat16).astype(jnp.float32)
    clean = xr @ wgr.T                                            # [B, E]
    load_ref = jax.nn.softmax(clean, axis=-1)

    # ---- eval-mode path (deterministic) ----
    gates_em, load_em = noisy_topk_gating(x, w_gate, w_noise, training=False)
    jax.block_until_ready((gates_em, load_em))
    gates, load = gates_em.T, load_em.T                           # [B, E] for checks only

    topv, topi = lax.top_k(clean, TOP_K)
    gates_ref = jnp.zeros_like(clean).at[
        jnp.arange(BATCH)[:, None], topi].set(jax.nn.softmax(topv, axis=-1))
    assert jnp.allclose(gates, gates_ref, atol=2e-3), "eval gates mismatch"
    assert jnp.allclose(load, load_ref, atol=2e-3), "eval load mismatch"

    # ---- training-mode path (same noise re-derived here) ----
    gates_t_em, load_t_em = noisy_topk_gating(x, w_gate, w_noise,
                                              training=True, noise_key=keps)
    jax.block_until_ready((gates_t_em, load_t_em))
    gates_t, load_t = gates_t_em.T, load_t_em.T

    eps = jax.random.normal(keps, (NUM_EXPERTS, BATCH), dtype=jnp.float32).T  # [B, E]
    noise_logits = xr @ wnr.T
    noisy = clean + eps * jax.nn.softplus(noise_logits) * NOISE_EPS
    topv_t, topi_t = lax.top_k(noisy, TOP_K)
    gates_t_ref = jnp.zeros_like(noisy).at[
        jnp.arange(BATCH)[:, None], topi_t].set(jax.nn.softmax(topv_t, axis=-1))
    assert jnp.allclose(gates_t, gates_t_ref, atol=2e-3), "train gates mismatch"
    assert jnp.allclose(load_t, load_ref, atol=2e-3), "train load mismatch"
    assert jnp.allclose(jnp.sum(gates_t, axis=-1), 1.0, atol=1e-4)
    assert int(jnp.max(jnp.sum(gates_t > 0, axis=-1))) <= TOP_K

    print("KERNEL_OK")
</pallas_src>

<mosaic_0001>
module attributes {stable_mosaic.version = 11 : i64} {
  func.func @gating_eval_kernel(%arg0: i32, %arg1: memref<128x32xbf16, #tpu.memory_space<vmem>>, %arg2: memref<8x32xbf16, #tpu.memory_space<vmem>>, %arg3: memref<16x128xf32, #tpu.memory_space<vmem>>) attributes {dimension_semantics = [#tpu.dimension_semantics<parallel>], iteration_bounds = array<i64: 1>, scalar_prefetch = 0 : i64, scratch_operands = 0 : i64, tpu.core_type = #tpu.core_type<tc>, window_params = [{transform_indices = @transform_0, window_bounds = array<i64: 128, 32>}, {pipeline_mode = #tpu.pipeline_mode<synchronous>, transform_indices = @transform_1, window_bounds = array<i64: 8, 32>}, {transform_indices = @transform_2, window_bounds = array<i64: 16, 128>}]} {
    %c0 = arith.constant 0 : index
    %c0_0 = arith.constant 0 : index
    %0 = vector.load %arg2[%c0, %c0_0] : memref<8x32xbf16, #tpu.memory_space<vmem>>, vector<8x32xbf16>
    %c0_1 = arith.constant 0 : index
    %c0_2 = arith.constant 0 : index
    %1 = vector.load %arg1[%c0_1, %c0_2] : memref<128x32xbf16, #tpu.memory_space<vmem>>, vector<128x32xbf16>
    %cst = arith.constant dense<0.000000e+00> : vector<8x128xf32>
    %2 = tpu.matmul %0, %1, %cst {dimension_numbers = #tpu.dot_dimension_numbers<[1], [1], [0], [0], [0, 0, 1, 0], [], []>} : vector<8x32xbf16>, vector<128x32xbf16>, vector<8x128xf32> -> vector<8x128xf32>
    %3 = tpu.iota {dimensions = array<i32: 0>} : vector<8x128xi32>
    %false = arith.constant false
    %4 = vector.broadcast %false : i1 to vector<8x128xi1>
    %cst_3 = arith.constant dense<0xFF800000> : vector<128xf32>
    %5 = vector.multi_reduction <maximumf>, %2, %cst_3 [0] : vector<8x128xf32> to vector<128xf32>
    %6 = vector.shape_cast %5 : vector<128xf32> to vector<1x128xf32>
    %7 = vector.broadcast %6 : vector<1x128xf32> to vector<8x128xf32>
    %8 = arith.cmpf oeq, %2, %7 : vector<8x128xf32>
    %c8_i32 = arith.constant 8 : i32
    %9 = vector.broadcast %c8_i32 : i32 to vector<8x128xi32>
    %10 = arith.select %8, %3, %9 : vector<8x128xi1>, vector<8x128xi32>
    %cst_4 = arith.constant dense<2147483647> : vector<128xi32>
    %11 = vector.multi_reduction <minsi>, %10, %cst_4 [0] : vector<8x128xi32> to vector<128xi32>
    %12 = vector.shape_cast %11 : vector<128xi32> to vector<1x128xi32>
    %13 = vector.broadcast %12 : vector<1x128xi32> to vector<8x128xi32>
    %14 = arith.cmpi eq, %3, %13 : vector<8x128xi32>
    %15 = arith.ori %4, %14 : vector<8x128xi1>
    %cst_5 = arith.constant 0xFF800000 : f32
    %16 = vector.broadcast %cst_5 : f32 to vector<8x128xf32>
    %17 = arith.select %14, %16, %2 : vector<8x128xi1>, vector<8x128xf32>
    %cst_6 = arith.constant dense<0xFF800000> : vector<128xf32>
    %18 = vector.multi_reduction <maximumf>, %17, %cst_6 [0] : vector<8x128xf32> to vector<128xf32>
    %19 = vector.shape_cast %18 : vector<128xf32> to vector<1x128xf32>
    %20 = vector.broadcast %19 : vector<1x128xf32> to vector<8x128xf32>
    %21 = arith.cmpf oeq, %17, %20 : vector<8x128xf32>
    %c8_i32_7 = arith.constant 8 : i32
    %22 = vector.broadcast %c8_i32_7 : i32 to vector<8x128xi32>
    %23 = arith.select %21, %3, %22 : vector<8x128xi1>, vector<8x128xi32>
    %cst_8 = arith.constant dense<2147483647> : vector<128xi32>
    %24 = vector.multi_reduction <minsi>, %23, %cst_8 [0] : vector<8x128xi32> to vector<128xi32>
    %25 = vector.shape_cast %24 : vector<128xi32> to vector<1x128xi32>
    %26 = vector.broadcast %25 : vector<1x128xi32> to vector<8x128xi32>
    %27 = arith.cmpi eq, %3, %26 : vector<8x128xi32>
    %28 = arith.ori %15, %27 : vector<8x128xi1>
    %cst_9 = arith.constant 0xFF800000 : f32
    %29 = vector.broadcast %cst_9 : f32 to vector<8x128xf32>
    %30 = arith.select %28, %2, %29 : vector<8x128xi1>, vector<8x128xf32>
    %cst_10 = arith.constant dense<0xFF800000> : vector<128xf32>
    %31 = vector.multi_reduction <maximumf>, %30, %cst_10 [0] : vector<8x128xf32> to vector<128xf32>
    %32 = vector.shape_cast %31 : vector<128xf32> to vector<1x128xf32>
    %33 = vector.broadcast %32 : vector<1x128xf32> to vector<8x128xf32>
    %34 = arith.subf %30, %33 : vector<8x128xf32>
    %35 = math.exp %34 : vector<8x128xf32>
    %cst_11 = arith.constant 0.000000e+00 : f32
    %36 = vector.broadcast %cst_11 : f32 to vector<8x128xf32>
    %37 = arith.select %28, %35, %36 : vector<8x128xi1>, vector<8x128xf32>
    %cst_12 = arith.constant dense<0.000000e+00> : vector<128xf32>
    %38 = vector.multi_reduction <add>, %37, %cst_12 [0] : vector<8x128xf32> to vector<128xf32>
    %39 = vector.shape_cast %38 : vector<128xf32> to vector<1x128xf32>
    %40 = vector.broadcast %39 : vector<1x128xf32> to vector<8x128xf32>
    %41 = arith.divf %37, %40 : vector<8x128xf32>
    %c0_13 = arith.constant 0 : index
    %c0_14 = arith.constant 0 : index
    %42 = vector.load %arg3[%c0_13, %c0_14] : memref<16x128xf32, #tpu.memory_space<vmem>>, vector<8x128xf32>
    tpu.vector_store %arg3[%c0_13, %c0_14], %41 {strides = array<i32>} : memref<16x128xf32, #tpu.memory_space<vmem>>, vector<8x128xf32>,
    %cst_15 = arith.constant dense<0xFF800000> : vector<128xf32>
    %43 = vector.multi_reduction <maximumf>, %2, %cst_15 [0] : vector<8x128xf32> to vector<128xf32>
    %44 = vector.shape_cast %43 : vector<128xf32> to vector<1x128xf32>
    %45 = vector.broadcast %44 : vector<1x128xf32> to vector<8x128xf32>
    %46 = arith.subf %2, %45 : vector<8x128xf32>
    %47 = math.exp %46 : vector<8x128xf32>
    %cst_16 = arith.constant dense<0.000000e+00> : vector<128xf32>
    %48 = vector.multi_reduction <add>, %47, %cst_16 [0] : vector<8x128xf32> to vector<128xf32>
    %49 = vector.shape_cast %48 : vector<128xf32> to vector<1x128xf32>
    %50 = vector.broadcast %49 : vector<1x128xf32> to vector<8x128xf32>
    %51 = arith.divf %47, %50 : vector<8x128xf32>
    %c8 = arith.constant 8 : index
    %c0_17 = arith.constant 0 : index
    %52 = vector.load %arg3[%c8, %c0_17] : memref<16x128xf32, #tpu.memory_space<vmem>>, vector<8x128xf32>
    tpu.vector_store %arg3[%c8, %c0_17], %51 {strides = array<i32>} : memref<16x128xf32, #tpu.memory_space<vmem>>, vector<8x128xf32>,
    return
  }
  func.func @transform_0(%arg0: i32) -> (i32, i32) {
    %c0_i32 = arith.constant 0 : i32
    %c0_i32_0 = arith.constant 0 : i32
    return %arg0, %c0_i32 : i32, i32
  }
  func.func @transform_1(%arg0: i32) -> (i32, i32) {
    %c0_i32 = arith.constant 0 : i32
    %c0_i32_0 = arith.constant 0 : i32
    %c0_i32_1 = arith.constant 0 : i32
    return %c0_i32, %c0_i32_0 : i32, i32
  }
  func.func @transform_2(%arg0: i32) -> (i32, i32) {
    %c0_i32 = arith.constant 0 : i32
    %c0_i32_0 = arith.constant 0 : i32
    return %c0_i32, %arg0 : i32, i32
  }
}

</mosaic_0001>

<bundles_post_ra>
// kernel: tpu_custom_call.1
= control target key start
LH: loop header
LB: loop body
LE: loop exit
PB: predicated region body
PF: predicated region fallthrough
CT: control target
= control target key end

     0   :  { %vm69_vm0 = vcmask 261120   ;;  %s371_s0 = inlined_call_operand.vmem [shape: bf16[128,32], index: 0, kind: input, shape index: {}]   ;;  %s372_s1 = inlined_call_operand.vmem [shape: bf16[8,32], index: 1, kind: input, shape index: {}]   ;;  %s373_s2 = inlined_call_operand.hbm [shape: f32[16,128], index: 2, kind: output, shape index: {}]  }
   0x1   :  { %v266_v0 = vld [vmem:[%s371_s0 + $0x38] sm:$0xff] }
   0x2   :  { %7 = vsyncpa [#allocation3], 0  ;;  %v95_v1 = vsel %vm69_vm0, %v266_v0, 0  ;;  %v265_v2 = vld [vmem:[%s371_s0 + $0x30] sm:$0xff]  ;;  %v264_v4 = vld [vmem:[%s371_s0 + $0x28] sm:$0xff]  ;;  %v110_v21 = vlaneseq  ;;  %s214_s29 = sshll.u32 %s373_s2, 4  ;;  %s215_s29 = int_to_ptr.hbm [resolvable:$true] %s214_s29 }
   0x3   :  { %97 = vmatpush.bf16.xpose.msra.mxu0 %v95_v1  ;;  %v92_v3 = vsel %vm69_vm0, %v265_v2, 0  ;;  %v89_v5 = vsel %vm69_vm0, %v264_v4, 0  ;;  %v263_v6 = vld [vmem:[%s371_s0 + $0x20] sm:$0xff]  ;;  %v262_v8 = vld [vmem:[%s371_s0 + $0x18] sm:$0xff]  ;;  %v261_v10 = vld [vmem:[%s371_s0 + $0x10] sm:$0xff]  ;;  %s305_s30 = smov 128  }
   0x4   :  { %v86_v7 = vsel %vm69_vm0, %v263_v6, 0  ;;  %v83_v9 = vsel %vm69_vm0, %v262_v8, 0  ;;  %v80_v11 = vsel %vm69_vm0, %v261_v10, 0  ;;  %v260_v12 = vld [vmem:[%s371_s0 + $0x8] sm:$0xff]  ;;  %v259_v14 = vld [vmem:[%s371_s0] sm:$0xff]  ;;  %v111_v25 = vshrl.u32 %v110_v21, 7 }
   0x5   :  { %v77_v13 = vsel %vm69_vm0, %v260_v12, 0  ;;  %v74_v15 = vsel %vm69_vm0, %v259_v14, 0  ;;  %v12_v16 = vld [vmem:[%s372_s1] sm:$0xf]  ;;  %s304_s0 = smov [#allocation2]   ;;  %s306_s3 = smov 8  }
   0x6   :  { %s212_s1 = sshll.u32 %s304_s0, 4  ;;  %s213_s1 = int_to_ptr.vmem [resolvable:$true] %s212_s1 }
   0xb   :  { %98 = vmatpush.bf16.xpose.msra.mxu0 %v92_v3 }
  0x13   :  { %99 = vmatpush.bf16.xpose.msra.mxu0 %v89_v5 }
  0x1b   :  { %100 = vmatpush.bf16.xpose.msra.mxu0 %v86_v7 }
  0x23   :  { %101 = vmatpush.bf16.xpose.msra.mxu0 %v83_v9 }
  0x2b   :  { %102 = vmatpush.bf16.xpose.msra.mxu0 %v80_v11 }
  0x33   :  { %103 = vmatpush.bf16.xpose.msra.mxu0 %v77_v13 }
  0x3b   :  { %104 = vmatpush.bf16.xpose.msra.mxu0 %v74_v15 }
  0x42   :  { %258 = vmatmul.msk.bf16.vlgmr.msra.gmra.mxu0 %vm69_vm0, %v12_v16 }
  0xbf   :  { %v358_v17 = vpop.f32.mrf.mxu0 }
  0xc0   :  { %v112_v18 = vrot.slane %v358_v17, 4 }
  0xc2   :  { %v113_v19 = vmax.f32 %v358_v17, %v112_v18 }
  0xc4   :  { %v114_v20 = vrot.slane %v113_v19, 2 }
  0xc6   :  { %v115_v22 = vmax.f32 %v113_v19, %v114_v20 }
  0xc7   :  { %v108_v23 = vpop.f32.mrf.mxu0 }
  0xc8   :  { %v116_v24 = vrot.slane %v115_v22, 1 }
  0xca   :  { %v117_v26 = vmax.f32 %v115_v22, %v116_v24 }
  0xcc   :  { %vm118_vm1 = vcmp.eq.f32.partialorder %v358_v17, %v117_v26  ;;  %v183_v27 = vsub.f32 %v358_v17, %v117_v26 }
  0xcd   :  { %v119_v28 = vsel %vm118_vm1, %v111_v25, 8 }
  0xce   :  { %v120_v29 = vrot.slane %v119_v28, 4  ;;  %v184_v30 = vmul.f32 1.442695, %v183_v27 }
  0xd0   :  { %vm121_vm2 = vcmp.lt.s32.totalorder %v119_v28, %v120_v29  ;;  %270 = vpow2.f32 %v184_v30 }
  0xd1   :  { %v122_v31 = vsel %vm121_vm2, %v119_v28, %v120_v29 }
  0xd2   :  { %v123_v32 = vrot.slane %v122_v31, 2 }
  0xd4   :  { %vm124_vm3 = vcmp.lt.s32.totalorder %v122_v31, %v123_v32 }
  0xd5   :  { %v125_v33 = vsel %vm124_vm3, %v122_v31, %v123_v32 }
  0xd6   :  { %v271_v34 = vpop.eup %270  ;;  %v126_v35 = vrot.slane %v125_v33, 1 }
  0xd7   :  { %v186_v36 = vrot.slane %v271_v34, 4 }
  0xd8   :  { %vm127_vm4 = vcmp.lt.s32.totalorder %v125_v33, %v126_v35 }
  0xd9   :  { %v128_v37 = vsel %vm127_vm4, %v125_v33, %v126_v35  ;;  %v187_v38 = vadd.f32 %v271_v34, %v186_v36 }
  0xda   :  { %vm129_vm5 = vcmp.eq.s32.totalorder %v111_v25, %v128_v37 }
  0xdb   :  { %v130_v39 = vsel %vm129_vm5, -inf, %v358_v17  ;;  %v188_v40 = vrot.slane %v187_v38, 2 }
  0xdc   :  { %v131_v41 = vrot.slane %v130_v39, 4 }
  0xdd   :  { %v189_v42 = vadd.f32 %v188_v40, %v187_v38 }
  0xde   :  { %v132_v43 = vmax.f32 %v130_v39, %v131_v41 }
  0xdf   :  { %v190_v44 = vrot.slane %v189_v42, 1 }
  0xe0   :  { %v133_v45 = vrot.slane %v132_v43, 2 }
  0xe1   :  { %v191_v46 = vadd.f32 %v190_v44, %v189_v42 }
  0xe2   :  { %v134_v47 = vmax.f32 %v132_v43, %v133_v45 }
  0xe3   :  { %272 = vrcp.f32 %v191_v46  ;;  %v203_v56 = vand.u32 2147483648, %v191_v46  ;;  %v201_v59 = vand.u32 2147483647, %v191_v46  ;;  %vm197_vm10 = vweird.f32 %v191_v46 }
  0xe4   :  { %v135_v48 = vrot.slane %v134_v47, 1 }
  0xe5   :  { %v204_v62 = vor.u32 1.1754944e-38, %v203_v56  ;;  %vm202_vm12 = vcmp.eq.f32.partialorder %v201_v59, 8.507059e+37 }
  0xe6   :  { %v136_v49 = vmax.f32 %v134_v47, %v135_v48 }
  0xe8   :  { %vm137_vm6 = vcmp.eq.f32.partialorder %v130_v39, %v136_v49 }
  0xe9   :  { %v273_v50 = vpop.eup %272  ;;  %v138_v51 = vsel %vm137_vm6, %v111_v25, 8 }
  0xea   :  { %v139_v52 = vrot.slane %v138_v51, 4  ;;  %v193_v53 = vmul.f32 %v273_v50, %v191_v46  ;;  %vm198_vm8 = vweird.f32 %v273_v50 }
  0xeb   :  { %vm199_vm11 = vmor %vm197_vm10, %vm198_vm8 }
  0xec   :  { %vm140_vm7 = vcmp.lt.s32.totalorder %v138_v51, %v139_v52  ;;  %v194_v54 = vsub.f32 1.0, %v193_v53 }
  0xed   :  { %v141_v55 = vsel %vm140_vm7, %v138_v51, %v139_v52 }
  0xee   :  { %v142_v57 = vrot.slane %v141_v55, 2  ;;  %v195_v58 = vmul.f32 %v273_v50, %v194_v54 }
  0xf0   :  { %vm143_vm9 = vcmp.lt.s32.totalorder %v141_v55, %v142_v57  ;;  %v196_v60 = vadd.f32 %v273_v50, %v195_v58 }
  0xf1   :  { %v144_v61 = vsel %vm143_vm9, %v141_v55, %v142_v57 }
  0xf2   :  { %v145_v63 = vrot.slane %v144_v61, 1  ;;  %v200_v0 = vsel %vm199_vm11, %v273_v50, %v196_v60 }
  0xf3   :  { %v205_v1 = vsel %vm202_vm12, %v204_v62, %v200_v0 }
  0xf4   :  { %vm146_vm13 = vcmp.lt.s32.totalorder %v144_v61, %v145_v63  ;;  %v206_v2 = vmul.f32 %v271_v34, %v205_v1 }
  0xf5   :  { %v147_v3 = vsel %vm146_vm13, %v144_v61, %v145_v63 }
  0xf6   :  { %vm148_vm14 = vcmp.eq.s32.totalorder %v111_v25, %v147_v3  ;;  %207 = vst [vmem:[#allocation2 + $0x8] sm:$0xff] %v206_v2 }
  0xf7   :  { %vm149_vm15 = vmor %vm129_vm5, %vm148_vm14 }
  0xf8   :  { %v150_v4 = vsel %vm149_vm15, %v358_v17, -inf }
  0xf9   :  { %v151_v5 = vrot.slane %v150_v4, 4 }
  0xfb   :  { %v152_v6 = vmax.f32 %v150_v4, %v151_v5 }
  0xfd   :  { %v153_v7 = vrot.slane %v152_v6, 2 }
  0xff   :  { %v154_v8 = vmax.f32 %v152_v6, %v153_v7 }
 0x101   :  { %v155_v9 = vrot.slane %v154_v8, 1 }
 0x103   :  { %v156_v10 = vmax.f32 %v154_v8, %v155_v9 }
 0x105   :  { %v157_v11 = vsub.f32 %v150_v4, %v156_v10 }
 0x107   :  { %v158_v12 = vmul.f32 1.442695, %v157_v11 }
 0x109   :  { %274 = vpow2.f32 %v158_v12 }
 0x10f   :  { %v275_v13 = vpop.eup %274 }
 0x110   :  { %v160_v14 = vsel %vm149_vm15, %v275_v13, 0.0 }
 0x111   :  { %v161_v15 = vrot.slane %v160_v14, 4 }
 0x113   :  { %v162_v16 = vadd.f32 %v161_v15, %v160_v14 }
 0x115   :  { %v163_v18 = vrot.slane %v162_v16, 2 }
 0x117   :  { %v164_v19 = vadd.f32 %v163_v18, %v162_v16 }
 0x119   :  { %v165_v20 = vrot.slane %v164_v19, 1 }
 0x11b   :  { %v166_v21 = vadd.f32 %v165_v20, %v164_v19 }
 0x11d   :  { %276 = vrcp.f32 %v166_v21  ;;  %v178_v24 = vand.u32 2147483648, %v166_v21  ;;  %v176_v26 = vand.u32 2147483647, %v166_v21  ;;  %vm172_vm1 = vweird.f32 %v166_v21 }
 0x11f   :  { %v179_v28 = vor.u32 1.1754944e-38, %v178_v24  ;;  %vm177_vm3 = vcmp.eq.f32.partialorder %v176_v26, 8.507059e+37 }
 0x123   :  { %v277_v22 = vpop.eup %276 }
 0x124   :  { %v168_v17 = vmul.f32 %v277_v22, %v166_v21  ;;  %vm173_vm0 = vweird.f32 %v277_v22 }
 0x125   :  { %vm174_vm2 = vmor %vm172_vm1, %vm173_vm0 }
 0x126   :  { %v169_v23 = vsub.f32 1.0, %v168_v17 }
 0x128   :  { %v170_v25 = vmul.f32 %v277_v22, %v169_v23 }
 0x12a   :  { %v171_v27 = vadd.f32 %v277_v22, %v170_v25 }
 0x12c   :  { %v175_v29 = vsel %vm174_vm2, %v277_v22, %v171_v27 }
 0x12d   :  { %v180_v30 = vsel %vm177_vm3, %v179_v28, %v175_v29 }
 0x12e   :  { %v181_v31 = vmul.f32 %v180_v30, %v160_v14 }
 0x130   :  { %182 = vst [vmem:[#allocation2] sm:$0xff] %v181_v31 }
 0x131   :  { %220 = dma.vmem_to_hbm [thread:$0]  %s213_s1, 256, %s215_s29, [#allocation3], %s305_s30, %s305_s30, %s306_s3  }
 0x132   :  { %302 = dma.done.wait [#allocation3], 256  }
 0x133   :  { %303 = vsyncadd [#allocation3], 4294967040 }
 0x134   :  { %225 = vsyncpa [#allocation3], 1 }

</bundles_post_ra>
